<compile_context>
chip_gen: v7x
topology: tpu7x:2x2x1
jax: 0.10.0
libtpu: 0.0.40
codegen_flags: <defaults>
</compile_context>

<pallas_src>
import jax
import jax.numpy as jnp
from jax.experimental import pallas as pl
from jax.experimental.pallas import tpu as pltpu


_ITEM = 4                                   # float32 bytes
_DEFAULT_BLOCK_BUDGET = 4 * 1024 * 1024     # ~4 MiB/block -> 4x = 16 MiB pipelined, VMEM-safe on v5e/v6e/v7x
_SMALL_PROBLEM_BYTES = 512 * 1024           # below this, one grid step beats per-step overhead
_VMEM_LIMIT_BYTES = 32 * 1024 * 1024        # raise scoped VMEM (within physical on all generations)


# --------------------------------- kernels ----------------------------------

def _small_kernel(w_ref, x_ref, o_ref):
    # Single grid step: whole problem resident in VMEM, per-batch weights (B,) in SMEM.
    for i in range(x_ref.shape[0]):                 # B is small & static on this path
        o_ref[i] = x_ref[i] * (1.0 / w_ref[i])      # exact scalar reciprocal, VPU broadcast mul


def _tiled_kernel(w_ref, x_ref, o_ref):
    b = pl.program_id(0)
    inv = 1.0 / w_ref[b]                # per-batch scalar reciprocal (SMEM read, scalar unit)
    o_ref[...] = x_ref[...] * inv       # lane-dense broadcast multiply on a (tr, tc) tile


# --------------------------------- tiling -----------------------------------

def _choose_tiles(R, C, budget_bytes):
    """Byte-budgeted (tr, tc): tr % 8 == 0 or tr == R; tc % 128 == 0 or tc == C."""
    # Lane (last) dim: keep full C when it fits alongside >=8 rows, else tile in
    # multiples of 128 (trailing partial tile is masked, which is legal).
    if C * 8 * _ITEM <= budget_bytes or C < 128:
        tc = C
    else:
        tc = max(128, min((C // 128) * 128,
                          ((budget_bytes // (8 * _ITEM)) // 128) * 128))
    # Sublane (row) dim from the remaining budget.
    rows = max(8, budget_bytes // (tc * _ITEM))
    tr = R if R <= rows else (rows // 8) * 8
    return tr, tc


# -------------------------------- wrapper -----------------------------------

def linear_forward(x, weight, *, block_budget_bytes=_DEFAULT_BLOCK_BUDGET,
                   donate_input=False):
    """out = x / weight  (weight shape (B,1,1), broadcast over trailing dims).

    x:      (B, R, C) float32
    weight: (B, 1, 1) float32 (PyTorch parameter layout)
    donate_input: alias the output onto x's HBM buffer (only if x is dead after).
    """
    x = x.astype(jnp.float32)
    B, R, C = x.shape
    w = weight.reshape(B).astype(jnp.float32)
    io_alias = {1: 0} if donate_input else {}
    total_bytes = B * R * C * _ITEM

    # Small-problem path: one grid step, no pipeline overhead.
    if total_bytes <= min(_SMALL_PROBLEM_BYTES, block_budget_bytes):
        return pl.pallas_call(
            _small_kernel,
            out_shape=jax.ShapeDtypeStruct((B, R, C), jnp.float32),
            in_specs=[
                pl.BlockSpec(memory_space=pltpu.MemorySpace.SMEM),   # weights (B,)
                pl.BlockSpec(memory_space=pltpu.MemorySpace.VMEM),   # whole x
            ],
            out_specs=pl.BlockSpec(memory_space=pltpu.MemorySpace.VMEM),
            input_output_aliases=io_alias,
        )(w, x)

    # Tiled path: byte-budgeted blocks, cdiv grid (ragged dims get masked tiles),
    # grid derived mostly from row/col tiles so both v7x TensorCores get real work.
    tr, tc = _choose_tiles(R, C, block_budget_bytes)
    grid = (B, pl.cdiv(R, tr), pl.cdiv(C, tc))
    tile = pl.BlockSpec((pl.Squeezed(), tr, tc), lambda b, r, c: (b, r, c))

    return pl.pallas_call(
        _tiled_kernel,
        out_shape=jax.ShapeDtypeStruct((B, R, C), jnp.float32),
        grid=grid,
        in_specs=[
            pl.BlockSpec(memory_space=pltpu.MemorySpace.SMEM),       # weights (B,) in SMEM
            tile,                                                    # input tile (tr, tc)
        ],
        out_specs=pl.BlockSpec((pl.Squeezed(), tr, tc), lambda b, r, c: (b, r, c)),
        input_output_aliases=io_alias,
        compiler_params=pltpu.CompilerParams(
            dimension_semantics=("parallel", "parallel", "parallel"),
            vmem_limit_bytes=_VMEM_LIMIT_BYTES),
    )(w, x)


# --------------------------------- demo -------------------------------------

if __name__ == "__main__":
    key = jax.random.PRNGKey(0)

    def make_case(k, B, R, C):
        kw, kx = jax.random.split(k)
        # weight init mirrors the torch module: N(0, 0.01) + 1, shape (batch_dim, 1, 1)
        weight = 1.0 + 0.01 * jax.random.normal(kw, (B, 1, 1), jnp.float32)
        x = jax.random.normal(kx, (B, R, C), jnp.float32)
        return weight, x

    k1, k2, k3 = jax.random.split(key, 3)

    # Case 1: tiny, sublane/lane aligned -> single-grid-step path.
    w1, x1 = make_case(k1, 4, 8, 128)
    o1 = linear_forward(x1, w1)
    jax.block_until_ready(o1)
    assert o1.shape == x1.shape and o1.dtype == jnp.float32
    assert jnp.allclose(o1, x1 / w1, rtol=1e-6, atol=1e-6)

    # Case 2: larger, ragged row count -> tiled path; a small byte budget forces
    # real row tiling (cdiv grid + masked trailing tile) to exercise the tiler.
    w2, x2 = make_case(k2, 2, 520, 384)
    o2 = linear_forward(x2, w2, block_budget_bytes=256 * 1024)
    jax.block_until_ready(o2)
    assert jnp.allclose(o2, x2 / w2, rtol=1e-6, atol=1e-6)

    # Case 3: odd, non-lane-aligned last dim handled by the single-step path.
    w3, x3 = make_case(k3, 3, 12, 200)
    o3 = linear_forward(x3, w3)
    jax.block_until_ready(o3)
    assert jnp.allclose(o3, x3 / w3, rtol=1e-6, atol=1e-6)

    print("KERNEL_OK")
</pallas_src>

<mosaic_0001>
module attributes {stable_mosaic.version = 11 : i64} {
  func.func @_small_kernel(%arg0: memref<4xf32, #tpu.memory_space<smem>>, %arg1: memref<4x8x128xf32, #tpu.memory_space<vmem>>, %arg2: memref<4x8x128xf32, #tpu.memory_space<vmem>>) attributes {dimension_semantics = [], scalar_prefetch = 0 : i64, scratch_operands = 0 : i64, tpu.core_type = #tpu.core_type<tc>} {
    %c0 = arith.constant 0 : index
    %c0_0 = arith.constant 0 : index
    %c0_1 = arith.constant 0 : index
    %0 = vector.load %arg1[%c0, %c0_0, %c0_1] : memref<4x8x128xf32, #tpu.memory_space<vmem>>, vector<1x8x128xf32>
    %1 = vector.shape_cast %0 : vector<1x8x128xf32> to vector<8x128xf32>
    %c0_2 = arith.constant 0 : index
    %2 = memref.load %arg0[%c0_2] : memref<4xf32, #tpu.memory_space<smem>>
    %cst = arith.constant 1.000000e+00 : f32
    %3 = arith.divf %cst, %2 : f32
    %4 = vector.broadcast %3 : f32 to vector<8x128xf32>
    %5 = arith.mulf %1, %4 : vector<8x128xf32>
    %c0_3 = arith.constant 0 : index
    %c0_4 = arith.constant 0 : index
    %c0_5 = arith.constant 0 : index
    %6 = vector.load %arg2[%c0_3, %c0_4, %c0_5] : memref<4x8x128xf32, #tpu.memory_space<vmem>>, vector<1x8x128xf32>
    %7 = vector.shape_cast %6 : vector<1x8x128xf32> to vector<8x128xf32>
    %8 = vector.shape_cast %5 : vector<8x128xf32> to vector<1x8x128xf32>
    tpu.vector_store %arg2[%c0_3, %c0_4, %c0_5], %8 {strides = array<i32>} : memref<4x8x128xf32, #tpu.memory_space<vmem>>, vector<1x8x128xf32>,
    %c1 = arith.constant 1 : index
    %c0_6 = arith.constant 0 : index
    %c0_7 = arith.constant 0 : index
    %9 = vector.load %arg1[%c1, %c0_6, %c0_7] : memref<4x8x128xf32, #tpu.memory_space<vmem>>, vector<1x8x128xf32>
    %10 = vector.shape_cast %9 : vector<1x8x128xf32> to vector<8x128xf32>
    %c1_8 = arith.constant 1 : index
    %11 = memref.load %arg0[%c1_8] : memref<4xf32, #tpu.memory_space<smem>>
    %cst_9 = arith.constant 1.000000e+00 : f32
    %12 = arith.divf %cst_9, %11 : f32
    %13 = vector.broadcast %12 : f32 to vector<8x128xf32>
    %14 = arith.mulf %10, %13 : vector<8x128xf32>
    %c1_10 = arith.constant 1 : index
    %c0_11 = arith.constant 0 : index
    %c0_12 = arith.constant 0 : index
    %15 = vector.load %arg2[%c1_10, %c0_11, %c0_12] : memref<4x8x128xf32, #tpu.memory_space<vmem>>, vector<1x8x128xf32>
    %16 = vector.shape_cast %15 : vector<1x8x128xf32> to vector<8x128xf32>
    %17 = vector.shape_cast %14 : vector<8x128xf32> to vector<1x8x128xf32>
    tpu.vector_store %arg2[%c1_10, %c0_11, %c0_12], %17 {strides = array<i32>} : memref<4x8x128xf32, #tpu.memory_space<vmem>>, vector<1x8x128xf32>,
    %c2 = arith.constant 2 : index
    %c0_13 = arith.constant 0 : index
    %c0_14 = arith.constant 0 : index
    %18 = vector.load %arg1[%c2, %c0_13, %c0_14] : memref<4x8x128xf32, #tpu.memory_space<vmem>>, vector<1x8x128xf32>
    %19 = vector.shape_cast %18 : vector<1x8x128xf32> to vector<8x128xf32>
    %c2_15 = arith.constant 2 : index
    %20 = memref.load %arg0[%c2_15] : memref<4xf32, #tpu.memory_space<smem>>
    %cst_16 = arith.constant 1.000000e+00 : f32
    %21 = arith.divf %cst_16, %20 : f32
    %22 = vector.broadcast %21 : f32 to vector<8x128xf32>
    %23 = arith.mulf %19, %22 : vector<8x128xf32>
    %c2_17 = arith.constant 2 : index
    %c0_18 = arith.constant 0 : index
    %c0_19 = arith.constant 0 : index
    %24 = vector.load %arg2[%c2_17, %c0_18, %c0_19] : memref<4x8x128xf32, #tpu.memory_space<vmem>>, vector<1x8x128xf32>
    %25 = vector.shape_cast %24 : vector<1x8x128xf32> to vector<8x128xf32>
    %26 = vector.shape_cast %23 : vector<8x128xf32> to vector<1x8x128xf32>
    tpu.vector_store %arg2[%c2_17, %c0_18, %c0_19], %26 {strides = array<i32>} : memref<4x8x128xf32, #tpu.memory_space<vmem>>, vector<1x8x128xf32>,
    %c3 = arith.constant 3 : index
    %c0_20 = arith.constant 0 : index
    %c0_21 = arith.constant 0 : index
    %27 = vector.load %arg1[%c3, %c0_20, %c0_21] : memref<4x8x128xf32, #tpu.memory_space<vmem>>, vector<1x8x128xf32>
    %28 = vector.shape_cast %27 : vector<1x8x128xf32> to vector<8x128xf32>
    %c3_22 = arith.constant 3 : index
    %29 = memref.load %arg0[%c3_22] : memref<4xf32, #tpu.memory_space<smem>>
    %cst_23 = arith.constant 1.000000e+00 : f32
    %30 = arith.divf %cst_23, %29 : f32
    %31 = vector.broadcast %30 : f32 to vector<8x128xf32>
    %32 = arith.mulf %28, %31 : vector<8x128xf32>
    %c3_24 = arith.constant 3 : index
    %c0_25 = arith.constant 0 : index
    %c0_26 = arith.constant 0 : index
    %33 = vector.load %arg2[%c3_24, %c0_25, %c0_26] : memref<4x8x128xf32, #tpu.memory_space<vmem>>, vector<1x8x128xf32>
    %34 = vector.shape_cast %33 : vector<1x8x128xf32> to vector<8x128xf32>
    %35 = vector.shape_cast %32 : vector<8x128xf32> to vector<1x8x128xf32>
    tpu.vector_store %arg2[%c3_24, %c0_25, %c0_26], %35 {strides = array<i32>} : memref<4x8x128xf32, #tpu.memory_space<vmem>>, vector<1x8x128xf32>,
    return
  }
}

</mosaic_0001>

<bundles_post_ra>
// kernel: tpu_custom_call.1
= control target key start
LH: loop header
LB: loop body
LE: loop exit
PB: predicated region body
PF: predicated region fallthrough
CT: control target
= control target key end

     0   :  { %7 = vsyncpa [#allocation5], 0  ;;  %s239_s0 = inlined_call_operand.hbm [shape: f32[4], index: 0, kind: input, shape index: {}]   ;;  %s240_s1 = inlined_call_operand.hbm [shape: f32[4,8,128], index: 1, kind: input, shape index: {}]   ;;  %s241_s2 = inlined_call_operand.hbm [shape: f32[4,8,128], index: 2, kind: output, shape index: {}]  }
   0x1   :  { %8 = vsyncpa [#allocation3], 0 }
   0x2   :  { %9 = vsyncpa [#allocation4], 0  ;;  %s117_s11 = scalar_lea.hbm %s239_s0, 16 }
   0x3   :  { %p118_p0 = scmp.ne.s32.totalorder %s239_s0, %s117_s11  ;;  %p121_p1 = scmp.lt.u32.totalorder %s117_s11, %s239_s0 }
   0x5   :  { %p123_p2 = pnand %p121_p1, %p118_p0 }
   0x7   :  { %126 = shalt.err (!%p123_p2)
}
   0x8   :  { %s177_s16 = smov [#allocation2]   ;;  %s178_s19 = smov [#allocation6]  }
   0x9   :  { %17 = dma.hbm_to_smem %s239_s0, 16, %s177_s16, [#allocation5]  }
   0xa   :  { %s23_s20 = sshll.u32 %s178_s19, 4  ;;  %s127_s23 = scalar_lea.hbm %s240_s1, 512  ;;  %s24_s20 = int_to_ptr.vmem [resolvable:$true] %s23_s20 }
   0xb   :  { %p128_p3 = scmp.ne.s32.totalorder %s240_s1, %s127_s23  ;;  %p131_p4 = scmp.lt.u32.totalorder %s127_s23, %s240_s1 }
   0xd   :  { %p133_p5 = pnand %p131_p4, %p128_p3 }
   0xf   :  { %136 = shalt.err (!%p133_p5)
}
  0x10   :  { %s137_s28 = scalar_lea.vmem %s24_s20, 512  ;;  %p142_p7 = scmp.lt.s32.totalorder %s24_s20, %s24_s20 }
  0x11   :  { %p138_p6 = scmp.ne.s32.totalorder %s24_s20, %s137_s28  ;;  %p143_p8 = scmp.lt.s32.totalorder %s137_s28, %s137_s28 }
  0x13   :  { %p144_p9 = por %p143_p8, %p142_p7 }
  0x15   :  { %p145_p10 = pnand %p144_p9, %p138_p6 }
  0x17   :  { %148 = shalt.err (!%p145_p10)
}
  0x18   :  { %s179_s0 = smov 128   ;;  %s180_s29 = smov 8  }
  0x19   :  { %29 = dma.hbm_to_vmem [thread:$0]  %s240_s1, 512, %s24_s20, [#allocation3], %s179_s0, %s179_s0, %s180_s29  }
  0x1a   :  { %171 = dma.done.wait [#allocation5], 16  }
  0x1b   :  { %172 = vsyncadd [#allocation5], 4294967280 }
  0x1c   :  { %173 = dma.done.wait [#allocation3], 512  }
  0x1d   :  { %174 = vsyncadd [#allocation3], 4294966784 }
  0x1e   :  { %36 = sfence }
  0x1f   :  { %s38_s4 = sld [smem:[#allocation2]]  ;;  %s93_s5 = sld [smem:[#allocation2 + $0x1]]  ;;  %v37_v8 = vld [vmem:[#allocation6] sm:$0xff]  ;;  %v46_v9 = vld [vmem:[#allocation6 + $0x8] sm:$0xff]  ;;  %v56_v11 = vld [vmem:[#allocation6 + $0x10] sm:$0xff] }
  0x20   :  { %s94_s6 = sld [smem:[#allocation2 + $0x2]]  ;;  %s95_s7 = sld [smem:[#allocation2 + $0x3]]  ;;  %v66_v14 = vld [vmem:[#allocation6 + $0x18] sm:$0xff] }
  0x21   :  { %s181_s10 = smov [#allocation7]  }
  0x22   :  { %s80_s11 = sshll.u32 %s181_s10, 4  ;;  %s81_s11 = int_to_ptr.vmem [resolvable:$true] %s80_s11 }
  0x23   :  { %s149_s13 = scalar_lea.vmem %s81_s11, 512  ;;  %p154_p12 = scmp.lt.s32.totalorder %s81_s11, %s81_s11 }
  0x24   :  { %p150_p11 = scmp.ne.s32.totalorder %s81_s11, %s149_s13  ;;  %p155_p13 = scmp.lt.s32.totalorder %s149_s13, %s149_s13 }
  0x25   :  { %v39_v0 = vstv %s38_s4  ;;  %v48_v1 = vstv %s93_s5 }
  0x26   :  { %109 = vrcp.f32 %v39_v0  ;;  %v58_v2 = vstv %s94_s6  ;;  %v68_v3 = vstv %s95_s7  ;;  %p156_p0 = por %p155_p13, %p154_p12 }
  0x27   :  { %111 = vrcp.f32 %v48_v1 }
  0x28   :  { %113 = vrcp.f32 %v58_v2  ;;  %p157_p1 = pnand %p156_p0, %p150_p11 }
  0x29   :  { %115 = vrcp.f32 %v68_v3 }
  0x30   :  { %v110_v4 = vpop.eup %109 }
  0x31   :  { %v112_v5 = vpop.eup %111  ;;  %96 = vpush %v110_v4 }
  0x32   :  { %v114_v6 = vpop.eup %113  ;;  %98 = vpush %v112_v5 }
  0x33   :  { %v116_v7 = vpop.eup %115  ;;  %100 = vpush %v114_v6 }
  0x34   :  { %102 = vpush %v116_v7 }
  0x62   :  { %s97_s1 = spop %96 }
  0x63   :  { %v42_v10 = vstv %s97_s1  ;;  %s99_s8 = spop %98 }
  0x64   :  { %v43_v12 = vmul.f32 %v42_v10, %v37_v8  ;;  %v51_v13 = vstv %s99_s8  ;;  %s101_s9 = spop %100 }
  0x65   :  { %v52_v15 = vmul.f32 %v51_v13, %v46_v9  ;;  %v61_v16 = vstv %s101_s9  ;;  %s103_s12 = spop %102 }
  0x66   :  { %44 = vst [vmem:[#allocation7] sm:$0xff] %v43_v12  ;;  %v62_v17 = vmul.f32 %v61_v16, %v56_v11  ;;  %v71_v18 = vstv %s103_s12 }
  0x67   :  { %54 = vst [vmem:[#allocation7 + $0x8] sm:$0xff] %v52_v15  ;;  %v72_v19 = vmul.f32 %v71_v18, %v66_v14 }
  0x68   :  { %64 = vst [vmem:[#allocation7 + $0x10] sm:$0xff] %v62_v17 }
  0x69   :  { %74 = vst [vmem:[#allocation7 + $0x18] sm:$0xff] %v72_v19 }
  0x6a   :  { %160 = shalt.err (!%p157_p1)
}
  0x6b   :  { %s161_s16 = scalar_lea.hbm %s241_s2, 512 }
  0x6c   :  { %p162_p2 = scmp.ne.s32.totalorder %s241_s2, %s161_s16  ;;  %p165_p3 = scmp.lt.u32.totalorder %s161_s16, %s241_s2 }
  0x6e   :  { %p167_p4 = pnand %p165_p3, %p162_p2 }
  0x70   :  { %170 = shalt.err (!%p167_p4)
}
  0x71   :  { %86 = dma.vmem_to_hbm [thread:$0]  %s81_s11, 512, %s241_s2, [#allocation4], %s179_s0, %s179_s0, %s180_s29  }
  0x72   :  { %175 = dma.done.wait [#allocation4], 512  }
  0x73   :  { %176 = vsyncadd [#allocation4], 4294966784 }
  0x74   :  { %90 = vsyncpa [#allocation3], 1 }
  0x75   :  { %91 = vsyncpa [#allocation4], 1 }
  0x76   :  { %92 = vsyncpa [#allocation5], 1 }

</bundles_post_ra>
